<compile_context>
chip_gen: v7x
topology: tpu7x:2x2x1
jax: 0.10.0
libtpu: 0.0.40
codegen_flags: <defaults>
</compile_context>

<pallas_src>
import jax
import jax.numpy as jnp
from jax.experimental import pallas as pl
from jax.experimental.pallas import tpu as pltpu

# ----------------------------- "config" -------------------------------------
NUM_CAT = 8          # config.tne_encoder_quality_num_categories
CAT_DIM = 16         # config.tne_low_level_category_feature_output_dim
NUM_IN = 4           # config.numeric_normd_input_dim
RES_DIM = 16         # config.tne_low_level_resonance_output_dim
TEN_DIM = 16         # config.tne_low_level_tension_output_dim
LONG_IN = 2          # config.longevity_normd_input_dim
TIME_DIM = 16        # config.tne_low_level_time_output_dim
HIGH_DIM = 32        # config.tne_high_level_all_output_dim
COMB1_DIM = 64       # config.tne_combined_layer_linear_1_output_dim
FINAL_DIM = 32       # config.tne_combined_layer_final_output_dim
FEATURES_LEN = 4     # quality / resonance / tension / longevity

# config.high_embedding_weights
W_QUALITY = 1.0
W_RESONANCE = 0.75
W_TENSION = 1.25
W_LONGEVITY = 0.5

LEAKY_SLOPE = 0.01   # nn.LeakyReLU default negative_slope

# ------------------------- fused lane layouts --------------------------------
# input slab (bf16): [one_hot(8) | res(4) | ten(4) | lon(2) | 1 | pad(5)]
PACK_IN = 24
OH_OFF = 0
RES_IN_OFF = 8
TEN_IN_OFF = 12
LON_IN_OFF = 16
ONE_OFF = 18

# stage-1 activation slab a1 (128 lanes)
A1_W = 128
A1_QHIGH = 0         # 0:32   quality high (relu+scale folded into the table)
A1_QLOG = 32         # 32:40  quality logits recon
A1_QREC = 40         # 40     quality recon
A1_XRES = 64         # 64:80  x_res
A1_XTEN = 80         # 80:96  x_ten
A1_XLON = 96         # 96:112 x_lon
A1_ONE = 112         # 112    constant 1 carried for bias folding

# stage-2 activation slab hr (128 lanes)
HR_W = 128
HR_HR = 0            # 0:32   resonance high (scaled)
HR_RREC, HR_TREC, HR_LCOS, HR_LSIN = 41, 42, 43, 44   # recon lanes == out lanes
HR_HT = 64           # 64:96  tension high (scaled)
HR_HL = 96           # 96:128 longevity high (scaled)

# output slab (64 lanes, f32)
OUT_W = 64
OUT_EMB = 0          # 0:32   embedding_output
OUT_QLOG = 32        # 32:40  quality_logits_recon
OUT_QREC = 40        # 40     quality_recon
OUT_RREC, OUT_TREC, OUT_LCOS, OUT_LSIN = 41, 42, 43, 44


# ------------------------------ kernel --------------------------------------
def _tne_kernel(xin_ref, w1_ref, w2_ref, wc1a_ref, wc1r_ref, wc2_ref,
                vecs_ref, out_ref):
    xin = xin_ref[...]                                   # (bt, 24) bf16
    vecs = vecs_ref[...]                                 # (8, 128) f32
    pos1 = vecs[0:1, :]
    neg1 = vecs[1:2, :]
    pos2 = vecs[2:3, :]
    neg2 = vecs[3:4, :]
    maskq = vecs[4:5, 0:OUT_W]                           # routes q_logits/q_recon
    maskhr = vecs[5:6, 0:OUT_W]                          # routes r/t/l recon
    bout = vecs[6:7, 0:OUT_W]                            # bc2 padded to 64 lanes

    # Stage 1: fused [quality table | low-level linears(+bias) | const lane].
    y1 = jnp.dot(xin, w1_ref[...], preferred_element_type=jnp.float32)
    a1 = jnp.where(y1 > 0, y1 * pos1, y1 * neg1)         # (bt, 128) f32
    a1b = a1.astype(jnp.bfloat16)

    # Stage 2: fused r/t/l high-level embeds (scales in pos2) + recon heads;
    # b3 folded via the carried constant-1 lane.
    y2 = jnp.dot(a1b, w2_ref[...], preferred_element_type=jnp.float32)
    hr = jnp.where(y2 > 0, y2 * pos2, y2 * neg2)         # (bt, 128) f32
    hrb = hr.astype(jnp.bfloat16)

    # Combined layer linear 1 (split LHS -> no lane concat; bc1 via const lane).
    c1p = (jnp.dot(a1b, wc1a_ref[...], preferred_element_type=jnp.float32)
           + jnp.dot(hrb, wc1r_ref[...], preferred_element_type=jnp.float32))
    c1 = jnp.where(c1p > 0, c1p, LEAKY_SLOPE * c1p)      # (bt, 64) f32

    # Single lane-dense output slab; recon lanes are routed with masked VPU
    # adds (no routing matmul).
    out = (jnp.dot(c1.astype(jnp.bfloat16), wc2_ref[...],
                   preferred_element_type=jnp.float32)
           + a1[:, 0:OUT_W] * maskq
           + hr[:, 0:OUT_W] * maskhr
           + bout)
    out_ref[...] = out


# ------------------------- parameter fusion (wrapper) ------------------------
def _pack_params(p):
    f32 = jnp.float32
    z = lambda *s: jnp.zeros(s, f32)

    # ---- stage 1 fused table -------------------------------------------------
    emb = p["emb"]
    t_qh = jnp.maximum(emb @ p["wqh"] + p["bqh"], 0.0) * W_QUALITY     # (8,32)
    t_qlog = emb @ p["wql"] + p["bql"]                                  # (8,8)
    t_qrec = emb @ p["wqc"] + p["bqc"]                                  # (8,1)

    w1 = z(PACK_IN, A1_W)
    w1 = w1.at[OH_OFF:OH_OFF + NUM_CAT, A1_QHIGH:A1_QHIGH + HIGH_DIM].set(t_qh)
    w1 = w1.at[OH_OFF:OH_OFF + NUM_CAT, A1_QLOG:A1_QLOG + NUM_CAT].set(t_qlog)
    w1 = w1.at[OH_OFF:OH_OFF + NUM_CAT, A1_QREC:A1_QREC + 1].set(t_qrec)
    w1 = w1.at[RES_IN_OFF:RES_IN_OFF + NUM_IN, A1_XRES:A1_XRES + RES_DIM].set(p["wr"])
    w1 = w1.at[TEN_IN_OFF:TEN_IN_OFF + NUM_IN, A1_XTEN:A1_XTEN + TEN_DIM].set(p["wt"])
    w1 = w1.at[LON_IN_OFF:LON_IN_OFF + LONG_IN, A1_XLON:A1_XLON + TIME_DIM].set(p["wl"])
    w1 = w1.at[ONE_OFF, A1_XRES:A1_XRES + RES_DIM].set(p["br"][0])
    w1 = w1.at[ONE_OFF, A1_XTEN:A1_XTEN + TEN_DIM].set(p["bt"][0])
    w1 = w1.at[ONE_OFF, A1_XLON:A1_XLON + TIME_DIM].set(p["bl"][0])
    w1 = w1.at[ONE_OFF, A1_ONE].set(1.0)

    pos1 = z(1, A1_W)
    pos1 = pos1.at[:, A1_QHIGH:A1_QREC + 1].set(1.0)       # identity (table)
    pos1 = pos1.at[:, A1_XRES:A1_ONE + 1].set(1.0)         # relu/leaky + const
    neg1 = z(1, A1_W)
    neg1 = neg1.at[:, A1_QHIGH:A1_QREC + 1].set(1.0)       # identity
    neg1 = neg1.at[:, A1_XTEN:A1_XTEN + TEN_DIM].set(LEAKY_SLOPE)
    neg1 = neg1.at[:, A1_ONE].set(1.0)                     # keep const lane

    # ---- stage 2 fused table -------------------------------------------------
    w2 = z(A1_W, HR_W)
    w2 = w2.at[A1_XRES:A1_XRES + RES_DIM, HR_HR:HR_HR + HIGH_DIM].set(p["wrh"])
    w2 = w2.at[A1_XTEN:A1_XTEN + TEN_DIM, HR_HT:HR_HT + HIGH_DIM].set(p["wth"])
    w2 = w2.at[A1_XLON:A1_XLON + TIME_DIM, HR_HL:HR_HL + HIGH_DIM].set(p["wlh"])
    w2 = w2.at[A1_XRES:A1_XRES + RES_DIM, HR_RREC:HR_RREC + 1].set(p["wrr"])
    w2 = w2.at[A1_XTEN:A1_XTEN + TEN_DIM, HR_TREC:HR_TREC + 1].set(p["wtr"])
    w2 = w2.at[A1_XLON:A1_XLON + TIME_DIM, HR_LCOS:HR_LCOS + 2].set(p["wlr"])
    w2 = w2.at[A1_ONE, HR_HR:HR_HR + HIGH_DIM].set(p["brh"][0])
    w2 = w2.at[A1_ONE, HR_HT:HR_HT + HIGH_DIM].set(p["bth"][0])
    w2 = w2.at[A1_ONE, HR_HL:HR_HL + HIGH_DIM].set(p["blh"][0])
    w2 = w2.at[A1_ONE, HR_RREC].set(p["brr"][0, 0])
    w2 = w2.at[A1_ONE, HR_TREC].set(p["btr"][0, 0])
    w2 = w2.at[A1_ONE, HR_LCOS:HR_LCOS + 2].set(p["blr"][0])

    pos2 = z(1, HR_W)
    pos2 = pos2.at[:, HR_HR:HR_HR + HIGH_DIM].set(W_RESONANCE)
    pos2 = pos2.at[:, HR_RREC:HR_LSIN + 1].set(1.0)
    pos2 = pos2.at[:, HR_HT:HR_HT + HIGH_DIM].set(W_TENSION)
    pos2 = pos2.at[:, HR_HL:HR_HL + HIGH_DIM].set(W_LONGEVITY)
    neg2 = z(1, HR_W).at[:, HR_RREC:HR_LSIN + 1].set(1.0)

    # ---- combined layer linear 1 (split by source slab) -----------------------
    wc1 = p["wc1"]                                         # (128, 64)
    wc1a = z(A1_W, COMB1_DIM)
    wc1a = wc1a.at[A1_QHIGH:A1_QHIGH + HIGH_DIM, :].set(wc1[0:HIGH_DIM, :])
    wc1a = wc1a.at[A1_ONE, :].set(p["bc1"][0])             # bc1 via const lane
    wc1r = z(HR_W, COMB1_DIM)
    wc1r = wc1r.at[HR_HR:HR_HR + HIGH_DIM, :].set(wc1[HIGH_DIM:2 * HIGH_DIM, :])
    wc1r = wc1r.at[HR_HT:HR_HT + HIGH_DIM, :].set(wc1[2 * HIGH_DIM:3 * HIGH_DIM, :])
    wc1r = wc1r.at[HR_HL:HR_HL + HIGH_DIM, :].set(wc1[3 * HIGH_DIM:4 * HIGH_DIM, :])

    # ---- final linear padded into the 64-lane output slab ---------------------
    wc2 = z(COMB1_DIM, OUT_W).at[:, OUT_EMB:OUT_EMB + FINAL_DIM].set(p["wc2"])

    # ---- consolidated (8,128) f32 vector slab ---------------------------------
    vecs = z(8, 128)
    vecs = vecs.at[0, :].set(pos1[0])
    vecs = vecs.at[1, :].set(neg1[0])
    vecs = vecs.at[2, :].set(pos2[0])
    vecs = vecs.at[3, :].set(neg2[0])
    vecs = vecs.at[4, OUT_QLOG:OUT_QREC + 1].set(1.0)      # maskq
    vecs = vecs.at[5, OUT_RREC:OUT_LSIN + 1].set(1.0)      # maskhr
    vecs = vecs.at[6, OUT_EMB:OUT_EMB + FINAL_DIM].set(p["bc2"][0])   # bout

    bf = lambda a: a.astype(jnp.bfloat16)
    # MXU operands in bf16 (f32 accumulate in-kernel); VPU vectors stay f32.
    return (bf(w1), bf(w2), bf(wc1a), bf(wc1r), bf(wc2), vecs)


def _cdiv(a, b):
    return -(-a // b)


def _round_up(x, m):
    return (x + m - 1) // m * m


# ------------------------------ wrapper -------------------------------------
def tabular_numeric_encoder(quality_normd, resonance_normd, tension_normd,
                            longevity_normd, params, *, block_rows=2048):
    # Mimic the PyTorch 2-D path: quality_normd[:, 0].long()
    q_col = quality_normd[:, 0] if quality_normd.ndim == 2 else quality_normd
    idx = q_col.astype(jnp.int32)
    B = idx.shape[0]

    # one-hot built in the wrapper and packed into a single bf16 input slab:
    # [one_hot(8) | res(4) | ten(4) | lon(2) | 1 | pad] -> (B, 24)
    one_hot = (idx[:, None] == jnp.arange(NUM_CAT, dtype=jnp.int32)[None, :])
    xin = jnp.concatenate([
        one_hot.astype(jnp.bfloat16),
        resonance_normd.astype(jnp.bfloat16),
        tension_normd.astype(jnp.bfloat16),
        longevity_normd.astype(jnp.bfloat16),
        jnp.ones((B, 1), jnp.bfloat16),
        jnp.zeros((B, PACK_IN - ONE_OFF - 1), jnp.bfloat16),
    ], axis=1)

    weights = _pack_params(params)

    # Adaptive batch tile: >=2 grid steps so v7x's two TensorCores both get
    # work, multiple of 16 sublanes (bf16 packing), bounded padding waste,
    # capped at block_rows.  Working set per tile is a few hundred KiB.
    n_tiles = max(2, _cdiv(B, block_rows))
    bt = min(block_rows, _round_up(_cdiv(B, n_tiles), 16))
    Bp = _round_up(B, bt)
    if Bp != B:
        # padded rows are all-zero (incl. one-hot and const lane) -> clean
        xin = jnp.pad(xin, ((0, Bp - B), (0, 0)))

    slab = pl.pallas_call(
        _tne_kernel,
        out_shape=jax.ShapeDtypeStruct((Bp, OUT_W), jnp.float32),
        grid=(Bp // bt,),
        in_specs=[pl.BlockSpec((bt, PACK_IN), lambda i: (i, 0))]
                 + [pl.BlockSpec(w.shape, lambda i: (0, 0)) for w in weights],
        out_specs=pl.BlockSpec((bt, OUT_W), lambda i: (i, 0)),
        compiler_params=pltpu.CompilerParams(
            dimension_semantics=("parallel",)),
    )(xin, *weights)

    slab = slab[:B]
    return (slab[:, OUT_EMB:OUT_EMB + FINAL_DIM],      # embedding_output
            slab[:, OUT_QLOG:OUT_QLOG + NUM_CAT],      # quality_logits_recon
            slab[:, OUT_QREC:OUT_QREC + 1],            # quality_recon
            slab[:, OUT_RREC:OUT_RREC + 1],            # resonance_recon
            slab[:, OUT_TREC:OUT_TREC + 1],            # tension_recon
            slab[:, OUT_LCOS:OUT_LCOS + 1],            # longevity_cos_recon
            slab[:, OUT_LSIN:OUT_LSIN + 1])            # longevity_sin_recon


# ------------------------- deterministic params ------------------------------
def init_params(key):
    keys = jax.random.split(key, 32)
    k = iter(keys)

    def w(shape, kk, scale=0.1):
        return (scale * jax.random.normal(kk, shape)).astype(jnp.float32)

    def b(n, kk):
        return (0.01 * jax.random.normal(kk, (1, n))).astype(jnp.float32)

    p = {}
    p["emb"] = w((NUM_CAT, CAT_DIM), next(k))
    p["wr"], p["br"] = w((NUM_IN, RES_DIM), next(k)), b(RES_DIM, next(k))
    p["wt"], p["bt"] = w((NUM_IN, TEN_DIM), next(k)), b(TEN_DIM, next(k))
    p["wl"], p["bl"] = w((LONG_IN, TIME_DIM), next(k)), b(TIME_DIM, next(k))
    p["wqh"], p["bqh"] = w((CAT_DIM, HIGH_DIM), next(k)), b(HIGH_DIM, next(k))
    p["wrh"], p["brh"] = w((RES_DIM, HIGH_DIM), next(k)), b(HIGH_DIM, next(k))
    p["wth"], p["bth"] = w((TEN_DIM, HIGH_DIM), next(k)), b(HIGH_DIM, next(k))
    p["wlh"], p["blh"] = w((TIME_DIM, HIGH_DIM), next(k)), b(HIGH_DIM, next(k))
    p["wc1"], p["bc1"] = (w((HIGH_DIM * FEATURES_LEN, COMB1_DIM), next(k)),
                          b(COMB1_DIM, next(k)))
    p["wc2"], p["bc2"] = w((COMB1_DIM, FINAL_DIM), next(k)), b(FINAL_DIM, next(k))
    p["wqc"], p["bqc"] = w((CAT_DIM, 1), next(k)), b(1, next(k))
    p["wql"], p["bql"] = w((CAT_DIM, NUM_CAT), next(k)), b(NUM_CAT, next(k))
    p["wrr"], p["brr"] = w((RES_DIM, 1), next(k)), b(1, next(k))
    p["wtr"], p["btr"] = w((TEN_DIM, 1), next(k)), b(1, next(k))
    p["wlr"], p["blr"] = w((TIME_DIM, 2), next(k)), b(2, next(k))
    return p


# --------------------------- pure-JAX reference ------------------------------
def reference_forward(quality_normd, resonance_normd, tension_normd,
                      longevity_normd, p):
    idx = quality_normd[:, 0].astype(jnp.int32)
    x_q = p["emb"][idx]
    relu = lambda x: jnp.maximum(x, 0.0)
    leaky = lambda x: jnp.where(x > 0, x, LEAKY_SLOPE * x)
    x_r = relu(resonance_normd @ p["wr"] + p["br"])
    x_t = leaky(tension_normd @ p["wt"] + p["bt"])
    x_l = relu(longevity_normd @ p["wl"] + p["bl"])
    h_q = relu(x_q @ p["wqh"] + p["bqh"]) * W_QUALITY
    h_r = relu(x_r @ p["wrh"] + p["brh"]) * W_RESONANCE
    h_t = relu(x_t @ p["wth"] + p["bth"]) * W_TENSION
    h_l = relu(x_l @ p["wlh"] + p["blh"]) * W_LONGEVITY
    comb = jnp.concatenate([h_q, h_r, h_t, h_l], axis=1)
    emb_out = leaky(comb @ p["wc1"] + p["bc1"]) @ p["wc2"] + p["bc2"]
    qrec = x_q @ p["wqc"] + p["bqc"]
    qlog = x_q @ p["wql"] + p["bql"]
    rrec = x_r @ p["wrr"] + p["brr"]
    trec = x_t @ p["wtr"] + p["btr"]
    lrec = x_l @ p["wlr"] + p["blr"]
    return emb_out, qlog, qrec, rrec, trec, lrec[:, 0:1], lrec[:, 1:2]


if __name__ == "__main__":
    B = 8
    key = jax.random.PRNGKey(0)
    k_param, k_q, k_r, k_t, k_l = jax.random.split(key, 5)

    params = init_params(k_param)

    # quality is passed as a 2-D "normd" tensor whose first column holds the
    # category index (matching the PyTorch forward's 2-D branch).
    quality_normd = jax.random.randint(k_q, (B, 1), 0, NUM_CAT).astype(jnp.float32)
    resonance_normd = jax.random.normal(k_r, (B, NUM_IN), dtype=jnp.float32)
    tension_normd = jax.random.normal(k_t, (B, NUM_IN), dtype=jnp.float32)
    longevity_normd = jax.random.normal(k_l, (B, LONG_IN), dtype=jnp.float32)

    fwd = jax.jit(tabular_numeric_encoder)
    outs = jax.block_until_ready(fwd(quality_normd, resonance_normd,
                                     tension_normd, longevity_normd, params))

    refs = reference_forward(quality_normd, resonance_normd,
                             tension_normd, longevity_normd, params)
    names = ["embedding_output", "quality_logits_recon", "quality_recon",
             "resonance_recon", "tension_recon", "longevity_cos_recon",
             "longevity_sin_recon"]
    for n, o, r in zip(names, outs, refs):
        assert o.shape == r.shape, (n, o.shape, r.shape)
        # bf16 MXU operands (f32 accumulate) -> looser tolerance vs f32 reference
        assert jnp.allclose(o, r, atol=5e-3, rtol=5e-2), n

    print("KERNEL_OK")
</pallas_src>

<mosaic_0001>
module attributes {stable_mosaic.version = 11 : i64} {
  func.func @_tne_kernel(%arg0: i32, %arg1: memref<16x24xbf16, #tpu.memory_space<vmem>>, %arg2: memref<24x128xbf16, #tpu.memory_space<vmem>>, %arg3: memref<128x128xbf16, #tpu.memory_space<vmem>>, %arg4: memref<128x64xbf16, #tpu.memory_space<vmem>>, %arg5: memref<128x64xbf16, #tpu.memory_space<vmem>>, %arg6: memref<64x64xbf16, #tpu.memory_space<vmem>>, %arg7: memref<8x128xf32, #tpu.memory_space<vmem>>, %arg8: memref<16x64xf32, #tpu.memory_space<vmem>>) attributes {dimension_semantics = [#tpu.dimension_semantics<parallel>], iteration_bounds = array<i64: 1>, scalar_prefetch = 0 : i64, scratch_operands = 0 : i64, tpu.core_type = #tpu.core_type<tc>, window_params = [{transform_indices = @transform_0, window_bounds = array<i64: 16, 24>}, {pipeline_mode = #tpu.pipeline_mode<synchronous>, transform_indices = @transform_1, window_bounds = array<i64: 24, 128>}, {pipeline_mode = #tpu.pipeline_mode<synchronous>, transform_indices = @transform_2, window_bounds = array<i64: 128, 128>}, {pipeline_mode = #tpu.pipeline_mode<synchronous>, transform_indices = @transform_3, window_bounds = array<i64: 128, 64>}, {pipeline_mode = #tpu.pipeline_mode<synchronous>, transform_indices = @transform_4, window_bounds = array<i64: 128, 64>}, {pipeline_mode = #tpu.pipeline_mode<synchronous>, transform_indices = @transform_5, window_bounds = array<i64: 64, 64>}, {pipeline_mode = #tpu.pipeline_mode<synchronous>, transform_indices = @transform_6, window_bounds = array<i64: 8, 128>}, {transform_indices = @transform_7, window_bounds = array<i64: 16, 64>}]} {
    %c0 = arith.constant 0 : index
    %c0_0 = arith.constant 0 : index
    %0 = vector.load %arg1[%c0, %c0_0] : memref<16x24xbf16, #tpu.memory_space<vmem>>, vector<16x24xbf16>
    %c0_1 = arith.constant 0 : index
    %c0_2 = arith.constant 0 : index
    %1 = vector.load %arg7[%c0_1, %c0_2] : memref<8x128xf32, #tpu.memory_space<vmem>>, vector<8x128xf32>
    %2 = vector.extract_strided_slice %1 {offsets = [0, 0], sizes = [1, 128], strides = [1, 1]} : vector<8x128xf32> to vector<1x128xf32>
    %3 = vector.extract_strided_slice %1 {offsets = [1, 0], sizes = [1, 128], strides = [1, 1]} : vector<8x128xf32> to vector<1x128xf32>
    %4 = vector.extract_strided_slice %1 {offsets = [2, 0], sizes = [1, 128], strides = [1, 1]} : vector<8x128xf32> to vector<1x128xf32>
    %5 = vector.extract_strided_slice %1 {offsets = [3, 0], sizes = [1, 128], strides = [1, 1]} : vector<8x128xf32> to vector<1x128xf32>
    %6 = vector.extract_strided_slice %1 {offsets = [4, 0], sizes = [1, 64], strides = [1, 1]} : vector<8x128xf32> to vector<1x64xf32>
    %7 = vector.extract_strided_slice %1 {offsets = [5, 0], sizes = [1, 64], strides = [1, 1]} : vector<8x128xf32> to vector<1x64xf32>
    %8 = vector.extract_strided_slice %1 {offsets = [6, 0], sizes = [1, 64], strides = [1, 1]} : vector<8x128xf32> to vector<1x64xf32>
    %c0_3 = arith.constant 0 : index
    %c0_4 = arith.constant 0 : index
    %9 = vector.load %arg2[%c0_3, %c0_4] : memref<24x128xbf16, #tpu.memory_space<vmem>>, vector<24x128xbf16>
    %cst = arith.constant dense<0.000000e+00> : vector<16x128xf32>
    %10 = tpu.matmul %0, %9, %cst {dimension_numbers = #tpu.dot_dimension_numbers<[1], [0], [0], [1], [0, 0, 1, 1], [], []>} : vector<16x24xbf16>, vector<24x128xbf16>, vector<16x128xf32> -> vector<16x128xf32>
    %cst_5 = arith.constant 0.000000e+00 : f32
    %11 = vector.broadcast %cst_5 : f32 to vector<16x128xf32>
    %12 = arith.cmpf ogt, %10, %11 : vector<16x128xf32>
    %13 = vector.broadcast %2 : vector<1x128xf32> to vector<16x128xf32>
    %14 = arith.mulf %10, %13 : vector<16x128xf32>
    %15 = vector.broadcast %3 : vector<1x128xf32> to vector<16x128xf32>
    %16 = arith.mulf %10, %15 : vector<16x128xf32>
    %17 = arith.select %12, %14, %16 : vector<16x128xi1>, vector<16x128xf32>
    %18 = arith.truncf %17 : vector<16x128xf32> to vector<16x128xbf16>
    %c0_6 = arith.constant 0 : index
    %c0_7 = arith.constant 0 : index
    %19 = vector.load %arg3[%c0_6, %c0_7] : memref<128x128xbf16, #tpu.memory_space<vmem>>, vector<128x128xbf16>
    %cst_8 = arith.constant dense<0.000000e+00> : vector<16x128xf32>
    %20 = tpu.matmul %18, %19, %cst_8 {dimension_numbers = #tpu.dot_dimension_numbers<[1], [0], [0], [1], [0, 0, 1, 1], [], []>} : vector<16x128xbf16>, vector<128x128xbf16>, vector<16x128xf32> -> vector<16x128xf32>
    %cst_9 = arith.constant 0.000000e+00 : f32
    %21 = vector.broadcast %cst_9 : f32 to vector<16x128xf32>
    %22 = arith.cmpf ogt, %20, %21 : vector<16x128xf32>
    %23 = vector.broadcast %4 : vector<1x128xf32> to vector<16x128xf32>
    %24 = arith.mulf %20, %23 : vector<16x128xf32>
    %25 = vector.broadcast %5 : vector<1x128xf32> to vector<16x128xf32>
    %26 = arith.mulf %20, %25 : vector<16x128xf32>
    %27 = arith.select %22, %24, %26 : vector<16x128xi1>, vector<16x128xf32>
    %28 = arith.truncf %27 : vector<16x128xf32> to vector<16x128xbf16>
    %c0_10 = arith.constant 0 : index
    %c0_11 = arith.constant 0 : index
    %29 = vector.load %arg4[%c0_10, %c0_11] : memref<128x64xbf16, #tpu.memory_space<vmem>>, vector<128x64xbf16>
    %cst_12 = arith.constant dense<0.000000e+00> : vector<16x64xf32>
    %30 = tpu.matmul %18, %29, %cst_12 {dimension_numbers = #tpu.dot_dimension_numbers<[1], [0], [0], [1], [0, 0, 1, 1], [], []>} : vector<16x128xbf16>, vector<128x64xbf16>, vector<16x64xf32> -> vector<16x64xf32>
    %c0_13 = arith.constant 0 : index
    %c0_14 = arith.constant 0 : index
    %31 = vector.load %arg5[%c0_13, %c0_14] : memref<128x64xbf16, #tpu.memory_space<vmem>>, vector<128x64xbf16>
    %cst_15 = arith.constant dense<0.000000e+00> : vector<16x64xf32>
    %32 = tpu.matmul %28, %31, %cst_15 {dimension_numbers = #tpu.dot_dimension_numbers<[1], [0], [0], [1], [0, 0, 1, 1], [], []>} : vector<16x128xbf16>, vector<128x64xbf16>, vector<16x64xf32> -> vector<16x64xf32>
    %33 = arith.addf %30, %32 : vector<16x64xf32>
    %cst_16 = arith.constant 0.000000e+00 : f32
    %34 = vector.broadcast %cst_16 : f32 to vector<16x64xf32>
    %35 = arith.cmpf ogt, %33, %34 : vector<16x64xf32>
    %cst_17 = arith.constant 0.00999999977 : f32
    %36 = vector.broadcast %cst_17 : f32 to vector<16x64xf32>
    %37 = arith.mulf %36, %33 : vector<16x64xf32>
    %38 = arith.select %35, %33, %37 : vector<16x64xi1>, vector<16x64xf32>
    %39 = arith.truncf %38 : vector<16x64xf32> to vector<16x64xbf16>
    %c0_18 = arith.constant 0 : index
    %c0_19 = arith.constant 0 : index
    %40 = vector.load %arg6[%c0_18, %c0_19] : memref<64x64xbf16, #tpu.memory_space<vmem>>, vector<64x64xbf16>
    %cst_20 = arith.constant dense<0.000000e+00> : vector<16x64xf32>
    %41 = tpu.matmul %39, %40, %cst_20 {dimension_numbers = #tpu.dot_dimension_numbers<[1], [0], [0], [1], [0, 0, 1, 1], [], []>} : vector<16x64xbf16>, vector<64x64xbf16>, vector<16x64xf32> -> vector<16x64xf32>
    %42 = vector.extract_strided_slice %17 {offsets = [0, 0], sizes = [16, 64], strides = [1, 1]} : vector<16x128xf32> to vector<16x64xf32>
    %43 = vector.broadcast %6 : vector<1x64xf32> to vector<16x64xf32>
    %44 = arith.mulf %42, %43 : vector<16x64xf32>
    %45 = arith.addf %41, %44 : vector<16x64xf32>
    %46 = vector.extract_strided_slice %27 {offsets = [0, 0], sizes = [16, 64], strides = [1, 1]} : vector<16x128xf32> to vector<16x64xf32>
    %47 = vector.broadcast %7 : vector<1x64xf32> to vector<16x64xf32>
    %48 = arith.mulf %46, %47 : vector<16x64xf32>
    %49 = arith.addf %45, %48 : vector<16x64xf32>
    %50 = vector.broadcast %8 : vector<1x64xf32> to vector<16x64xf32>
    %51 = arith.addf %49, %50 : vector<16x64xf32>
    %c0_21 = arith.constant 0 : index
    %c0_22 = arith.constant 0 : index
    %52 = vector.load %arg8[%c0_21, %c0_22] : memref<16x64xf32, #tpu.memory_space<vmem>>, vector<16x64xf32>
    tpu.vector_store %arg8[%c0_21, %c0_22], %51 {strides = array<i32>} : memref<16x64xf32, #tpu.memory_space<vmem>>, vector<16x64xf32>,
    return
  }
  func.func @transform_0(%arg0: i32) -> (i32, i32) {
    %c0_i32 = arith.constant 0 : i32
    %c0_i32_0 = arith.constant 0 : i32
    return %arg0, %c0_i32 : i32, i32
  }
  func.func @transform_1(%arg0: i32) -> (i32, i32) {
    %c0_i32 = arith.constant 0 : i32
    %c0_i32_0 = arith.constant 0 : i32
    %c0_i32_1 = arith.constant 0 : i32
    return %c0_i32, %c0_i32_0 : i32, i32
  }
  func.func @transform_2(%arg0: i32) -> (i32, i32) {
    %c0_i32 = arith.constant 0 : i32
    %c0_i32_0 = arith.constant 0 : i32
    %c0_i32_1 = arith.constant 0 : i32
    return %c0_i32, %c0_i32_0 : i32, i32
  }
  func.func @transform_3(%arg0: i32) -> (i32, i32) {
    %c0_i32 = arith.constant 0 : i32
    %c0_i32_0 = arith.constant 0 : i32
    %c0_i32_1 = arith.constant 0 : i32
    return %c0_i32, %c0_i32_0 : i32, i32
  }
  func.func @transform_4(%arg0: i32) -> (i32, i32) {
    %c0_i32 = arith.constant 0 : i32
    %c0_i32_0 = arith.constant 0 : i32
    %c0_i32_1 = arith.constant 0 : i32
    return %c0_i32, %c0_i32_0 : i32, i32
  }
  func.func @transform_5(%arg0: i32) -> (i32, i32) {
    %c0_i32 = arith.constant 0 : i32
    %c0_i32_0 = arith.constant 0 : i32
    %c0_i32_1 = arith.constant 0 : i32
    return %c0_i32, %c0_i32_0 : i32, i32
  }
  func.func @transform_6(%arg0: i32) -> (i32, i32) {
    %c0_i32 = arith.constant 0 : i32
    %c0_i32_0 = arith.constant 0 : i32
    %c0_i32_1 = arith.constant 0 : i32
    return %c0_i32, %c0_i32_0 : i32, i32
  }
  func.func @transform_7(%arg0: i32) -> (i32, i32) {
    %c0_i32 = arith.constant 0 : i32
    %c0_i32_0 = arith.constant 0 : i32
    return %arg0, %c0_i32 : i32, i32
  }
}

</mosaic_0001>

<bundles_post_ra>
// kernel: tabular_numeric_encoder.1
= control target key start
LH: loop header
LB: loop body
LE: loop exit
PB: predicated region body
PF: predicated region fallthrough
CT: control target
= control target key end

     0   :  { %v740_v0 = vmov 0.0   ;;  %vm51_vm0 = vcmask 1043456   ;;  %vm741_vm1 = vmmov 0   ;;  %vm47_vm2 = vcmask 195584   ;;  %s953_s1 = inlined_call_operand.vmem [shape: bf16[24,128], index: 1, kind: input, shape index: {}]   ;;  %s954_s0 = inlined_call_operand.vmem [shape: bf16[16,24], index: 0, kind: input, shape index: {}]   ;;  %s955_s2 = inlined_call_operand.vmem [shape: bf16[128,128], index: 2, kind: input, shape index: {}]   ;;  %s956_s4 = inlined_call_operand.vmem [shape: bf16[128,64], index: 4, kind: input, shape index: {}]   ;;  %s957_s6 = inlined_call_operand.vmem [shape: f32[8,128], index: 6, kind: input, shape index: {}]   ;;  %s958_s3 = inlined_call_operand.vmem [shape: bf16[128,64], index: 3, kind: input, shape index: {}]   ;;  %s959_s5 = inlined_call_operand.vmem [shape: bf16[64,64], index: 5, kind: input, shape index: {}]   ;;  %s960_s7 = inlined_call_operand.vmem [shape: f32[16,64], index: 7, kind: output, shape index: {}]  }
   0x1   :  { %623 = vmatprep.subr.bf16.mxu1 %v740_v0  ;;  %v709_v1 = vld [vmem:[%s953_s1] sm:$0xff]   ;;  %627 = vmatprep.mubr.msk.bf16.mxu1 %vm741_vm1, %v740_v0  ;;  %v710_v2 = vld [vmem:[%s953_s1 + $0x8] ss:$0 sps:$4 sm:$0xff]   ;;  %v714_v7 = vld [vmem:[%s955_s2 + $0x10] sm:$0xff]   ;;  %v98_v19 = vlaneseq  ;;  %vm490_vm9 = vcmask 523264  }
   0x2   :  { %651 = vmatprep.subr.bf16.mxu0 %v740_v0  ;;  %667 = vmatprep.mubr.msk.bf16.mxu0 %vm741_vm1, %v740_v0  ;;  %v53_v3 = vsel %vm51_vm0, %v710_v2, 0  ;;  %v711_v4 = vld [vmem:[%s954_s0] sm:$0xff]   ;;  %v713_v6 = vld [vmem:[%s955_s2 + $0x8] sm:$0xff]   ;;  %v715_v8 = vld [vmem:[%s955_s2 + $0x18] sm:$0xff]  }
   0x3   :  { %624 = vmatpush3.bf16.msra.mxu1 %v709_v1  ;;  %v712_v5 = vld [vmem:[%s955_s2] sm:$0xff]   ;;  %v717_v10 = vld [vmem:[%s955_s2 + $0x28] sm:$0xff]   ;;  %v718_v11 = vld [vmem:[%s955_s2 + $0x30] sm:$0xff]   ;;  %v857_v20 = vshrl.u32 %v98_v19, 7 }
   0x4   :  { %625 = vmatprep.subr.bf16.mxu1 %v740_v0  ;;  %v716_v9 = vld [vmem:[%s955_s2 + $0x20] sm:$0xff]   ;;  %v719_v12 = vld [vmem:[%s955_s2 + $0x38] sm:$0xff]   ;;  %v721_v14 = vld [vmem:[%s956_s4 + $0x8] sm:$0xff]  }
   0x5   :  { %v720_v13 = vld [vmem:[%s956_s4] sm:$0xff]   ;;  %v722_v15 = vld [vmem:[%s956_s4 + $0x10] sm:$0xff]   ;;  %v723_v16 = vld [vmem:[%s956_s4 + $0x18] sm:$0xff]   ;;  %v100_v21 = vsub.s32 0, %v857_v20  ;;  %v106_v22 = vsub.s32 1, %v857_v20  ;;  %v222_v41 = vsub.s32 2, %v857_v20 }
   0x6   :  { %652 = vmatpush3.bf16.msra.mxu0 %v720_v13  ;;  %v724_v17 = vld [vmem:[%s956_s4 + $0x20] sm:$0xff]   ;;  %v725_v18 = vld [vmem:[%s956_s4 + $0x28] sm:$0xff]   ;;  %v726_v37 = vld [vmem:[%s956_s4 + $0x30] sm:$0xff]   ;;  %v228_v42 = vsub.s32 3, %v857_v20 }
   0x7   :  { %626 = vmatpush3.bf16.msra.mxu1 %v53_v3  ;;  %653 = vmatprep.subr.bf16.mxu0 %v740_v0  ;;  %v864_v23 = vld [vmem:[%s957_s6] sm:$0xff]  ;;  %v727_v38 = vld [vmem:[%s956_s4 + $0x38] sm:$0xff]   ;;  %v737_v40 = vld [vmem:[%s959_s5 + $0x8] sm:$0xff]  }
   0x8   :  { %631 = vmatprep.subr.bf16.mxu1 %v740_v0  ;;  %v101_v24 = vrot.slane %v864_v23, %v100_v21  ;;  %v107_v25 = vrot.slane %v864_v23, %v106_v22  ;;  %v736_v39 = vld [vmem:[%s959_s5] sm:$0xff]   ;;  %v223_v43 = vrot.slane %v864_v23, %v222_v41  ;;  %v229_v44 = vrot.slane %v864_v23, %v228_v42  ;;  %v729_v57 = vld [vmem:[%s958_s3 + $0x8] sm:$0xff]   ;;  %v730_v58 = vld [vmem:[%s958_s3 + $0x10] sm:$0xff]  }
   0x9   :  { %v728_v55 = vld [vmem:[%s958_s3] sm:$0xff]   ;;  %v731_v59 = vld [vmem:[%s958_s3 + $0x18] sm:$0xff]   ;;  %v733_v61 = vld [vmem:[%s958_s3 + $0x28] sm:$0xff]  }
   0xa   :  { %628 = vmatmul.mubr.msk.bf16.vlgmr.msra.gmra.mrb[0].mxu1 %vm47_vm2, %v711_v4  ;;  %654 = vmatpush3.bf16.msra.mxu0 %v721_v14  ;;  %v732_v60 = vld [vmem:[%s958_s3 + $0x20] sm:$0xff]   ;;  %v734_v62 = vld [vmem:[%s958_s3 + $0x30] sm:$0xff]   ;;  %v735_v63 = vld [vmem:[%s958_s3 + $0x38] sm:$0xff]  }
   0xb   :  { %632 = vmatpush3.bf16.msra.mxu1 %v712_v5  ;;  %647 = vmatprep.mubr.msk.bf16.mxu1 %vm741_vm1, %v740_v0  ;;  %v738_v1 = vld [vmem:[%s959_s5 + $0x10] sm:$0xff]   ;;  %v739_v2 = vld [vmem:[%s959_s5 + $0x18] sm:$0xff]  }
   0xc   :  { %633 = vmatprep.subr.bf16.mxu1 %v740_v0  ;;  %655 = vmatprep.subr.bf16.mxu0 %v740_v0 }
   0xe   :  { %656 = vmatpush3.bf16.msra.mxu0 %v722_v15  ;;  %v545_v15 = vsub.s32 6, %v857_v20 }
   0xf   :  { %634 = vmatpush3.bf16.msra.mxu1 %v713_v6  ;;  %657 = vmatprep.subr.bf16.mxu0 %v740_v0 }
  0x10   :  { %635 = vmatprep.subr.bf16.mxu1 %v740_v0  ;;  %v546_v21 = vrot.slane %v864_v23, %v545_v15 }
  0x12   :  { %658 = vmatpush3.bf16.msra.mxu0 %v723_v16 }
  0x13   :  { %636 = vmatpush3.bf16.msra.mxu1 %v714_v7  ;;  %659 = vmatprep.subr.bf16.mxu0 %v740_v0 }
  0x14   :  { %637 = vmatprep.subr.bf16.mxu1 %v740_v0 }
  0x16   :  { %660 = vmatpush3.bf16.msra.mxu0 %v724_v17 }
  0x17   :  { %638 = vmatpush3.bf16.msra.mxu1 %v715_v8  ;;  %661 = vmatprep.subr.bf16.mxu0 %v740_v0 }
  0x18   :  { %639 = vmatprep.subr.bf16.mxu1 %v740_v0 }
  0x1a   :  { %662 = vmatpush3.bf16.msra.mxu0 %v725_v18 }
  0x1b   :  { %640 = vmatpush3.bf16.msra.mxu1 %v716_v9  ;;  %663 = vmatprep.subr.bf16.mxu0 %v740_v0 }
  0x1c   :  { %641 = vmatprep.subr.bf16.mxu1 %v740_v0 }
  0x1e   :  { %664 = vmatpush3.bf16.msra.mxu0 %v726_v37 }
  0x1f   :  { %642 = vmatpush3.bf16.msra.mxu1 %v717_v10  ;;  %665 = vmatprep.subr.bf16.mxu0 %v740_v0 }
  0x20   :  { %643 = vmatprep.subr.bf16.mxu1 %v740_v0 }
  0x22   :  { %666 = vmatpush3.bf16.msra.mxu0 %v727_v38 }
  0x23   :  { %644 = vmatpush3.bf16.msra.mxu1 %v718_v11  ;;  %671 = vmatprep.subr.bf16.mxu0 %v740_v0 }
  0x24   :  { %645 = vmatprep.subr.bf16.mxu1 %v740_v0 }
  0x27   :  { %646 = vmatpush3.bf16.msra.mxu1 %v719_v12  ;;  %v537_v12 = vsub.s32 5, %v857_v20 }
  0x28   :  { %691 = vmatprep.subr.bf16.mxu1 %v740_v0 }
  0x29   :  { %v538_v14 = vrot.slane %v864_v23, %v537_v12 }
  0xdd   :  { %v89_v26 = vpop.f32.mrb[0].mxu1 }
  0xde   :  { %v102_v27 = vmul.f32 %v101_v24, %v89_v26  ;;  %v108_v28 = vmul.f32 %v107_v25, %v89_v26  ;;  %v629_v29 = vpop.f32.mrb[1].mxu1  ;;  %vm96_vm3 = vcmp.gt.f32.partialorder %v89_v26, 0.0 }
  0xdf   :  { %v92_v30 = vpop.f32.mrb[2].mxu1 }
  0xe0   :  { %vm97_vm4 = vcmp.gt.f32.partialorder %v92_v30, 0.0  ;;  %v103_v31 = vmul.f32 %v101_v24, %v92_v30  ;;  %v109_v32 = vmul.f32 %v107_v25, %v92_v30  ;;  %v630_v33 = vpop.f32.mrb[3].mxu1  ;;  %v868_v34 = vsel %vm96_vm3, %v102_v27, %v108_v28 }
  0xe2   :  { %v870_v35 = vsel %vm97_vm4, %v103_v31, %v109_v32 }
  0xe3   :  { %v112_v36 = vpack.c.bf16 %v870_v35, %v868_v34 }
  0xe5   :  { %648 = vmatmul.mubr.bf16.vlgmr.msra.gmra.mrb[4].mxu1 %v112_v36 }
  0xe6   :  { %699 = vmatprep.mubr.msk.bf16.mxu1 %vm741_vm1, %v740_v0  ;;  %692 = vmatpush3.bf16.msra.mxu1 %v736_v39 }
  0xe7   :  { %693 = vmatprep.subr.bf16.mxu1 %v740_v0 }
  0xea   :  { %694 = vmatpush3.bf16.msra.mxu1 %v737_v40 }
  0xeb   :  { %695 = vmatprep.subr.bf16.mxu1 %v740_v0 }
  0xee   :  { %696 = vmatpush3.bf16.msra.mxu1 %v738_v1 }
  0xef   :  { %697 = vmatprep.subr.bf16.mxu1 %v740_v0 }
  0xf2   :  { %698 = vmatpush3.bf16.msra.mxu1 %v739_v2 }
 0x1b8   :  { %v211_v45 = vpop.f32.mrb[4].mxu1 }
 0x1b9   :  { %v224_v46 = vmul.f32 %v223_v43, %v211_v45  ;;  %v230_v47 = vmul.f32 %v229_v44, %v211_v45  ;;  %v649_v48 = vpop.f32.mrb[5].mxu1  ;;  %vm218_vm5 = vcmp.gt.f32.partialorder %v211_v45, 0.0 }
 0x1ba   :  { %v214_v49 = vpop.f32.mrb[6].mxu1 }
 0x1bb   :  { %vm219_vm6 = vcmp.gt.f32.partialorder %v214_v49, 0.0  ;;  %v225_v50 = vmul.f32 %v223_v43, %v214_v49  ;;  %v231_v51 = vmul.f32 %v229_v44, %v214_v49  ;;  %v650_v52 = vpop.f32.mrb[7].mxu1  ;;  %v232_v53 = vsel %vm218_vm5, %v224_v46, %v230_v47 }
 0x1bc   :  { %v539_v19 = vmul.f32 %v538_v14, %v232_v53 }
 0x1bd   :  { %v233_v54 = vsel %vm219_vm6, %v225_v50, %v231_v51 }
 0x1be   :  { %v234_v56 = vpack.c.bf16 %v233_v54, %v232_v53  ;;  %v540_v28 = vmul.f32 %v538_v14, %v233_v54 }
 0x1c0   :  { %668 = vmatmul.mubr.bf16.vlgmr.msra.gmra.mrb[0].mxu0 %v234_v56 }
 0x1c1   :  { %672 = vmatpush3.bf16.msra.mxu0 %v728_v55  ;;  %687 = vmatprep.mubr.msk.bf16.mxu0 %vm741_vm1, %v740_v0 }
 0x1c2   :  { %673 = vmatprep.subr.bf16.mxu0 %v740_v0 }
 0x1c5   :  { %674 = vmatpush3.bf16.msra.mxu0 %v729_v57 }
 0x1c6   :  { %675 = vmatprep.subr.bf16.mxu0 %v740_v0 }
 0x1c9   :  { %676 = vmatpush3.bf16.msra.mxu0 %v730_v58 }
 0x1ca   :  { %677 = vmatprep.subr.bf16.mxu0 %v740_v0 }
 0x1cd   :  { %678 = vmatpush3.bf16.msra.mxu0 %v731_v59 }
 0x1ce   :  { %679 = vmatprep.subr.bf16.mxu0 %v740_v0 }
 0x1d1   :  { %680 = vmatpush3.bf16.msra.mxu0 %v732_v60 }
 0x1d2   :  { %681 = vmatprep.subr.bf16.mxu0 %v740_v0 }
 0x1d5   :  { %682 = vmatpush3.bf16.msra.mxu0 %v733_v61 }
 0x1d6   :  { %683 = vmatprep.subr.bf16.mxu0 %v740_v0 }
 0x1d9   :  { %684 = vmatpush3.bf16.msra.mxu0 %v734_v62 }
 0x1da   :  { %685 = vmatprep.subr.bf16.mxu0 %v740_v0  ;;  %v462_v0 = vsub.s32 4, %v857_v20 }
 0x1dc   :  { %v463_v13 = vrot.slane %v864_v23, %v462_v0 }
 0x1dd   :  { %686 = vmatpush3.bf16.msra.mxu0 %v735_v63 }
 0x1de   :  { %v464_v16 = vmul.f32 %v463_v13, %v868_v34  ;;  %v465_v24 = vmul.f32 %v463_v13, %v870_v35 }
 0x1e0   :  { %688 = vmatmul.mubr.bf16.vlgmr.msra.gmra.mrb[0].mxu0 %v112_v36 }
 0x2b3   :  { %v438_v3 = vpop.f32.mrb[0].mxu0 }
 0x2b4   :  { %v447_v4 = vmul.f32 0.01, %v438_v3  ;;  %v689_v5 = vpop.f32.mrb[1].mxu0  ;;  %vm445_vm7 = vcmp.gt.f32.partialorder %v438_v3, 0.0 }
 0x2b5   :  { %v441_v6 = vpop.f32.mrb[2].mxu0 }
 0x2b6   :  { %vm446_vm8 = vcmp.gt.f32.partialorder %v441_v6, 0.0  ;;  %v448_v7 = vmul.f32 0.01, %v441_v6  ;;  %v690_v8 = vpop.f32.mrb[3].mxu0  ;;  %v449_v9 = vsel %vm445_vm7, %v438_v3, %v447_v4 }
 0x2b8   :  { %v450_v10 = vsel %vm446_vm8, %v441_v6, %v448_v7 }
 0x2b9   :  { %v451_v11 = vpack.c.bf16 %v450_v10, %v449_v9 }
 0x2bb   :  { %700 = vmatmul.mubr.msk.bf16.vlgmr.msra.gmra.mrb[8].mxu1 %vm490_vm9, %v451_v11 }
 0x38e   :  { %v528_v17 = vpop.f32.mrb[8].mxu1 }
 0x38f   :  { %v529_v18 = vadd.f32 %v528_v17, %v464_v16  ;;  %v701_v22 = vpop.f32.mrb[9].mxu1 }
 0x390   :  { %v531_v25 = vpop.f32.mrb[10].mxu1 }
 0x391   :  { %v541_v26 = vadd.f32 %v539_v19, %v529_v18  ;;  %v532_v27 = vadd.f32 %v531_v25, %v465_v24  ;;  %v702_v29 = vpop.f32.mrb[11].mxu1 }
 0x393   :  { %v547_v30 = vadd.f32 %v546_v21, %v541_v26  ;;  %v542_v31 = vadd.f32 %v540_v28, %v532_v27 }
 0x395   :  { %549 = vst.msk [vmem:[%s960_s7] sm:$0xff] %vm490_vm9, %v547_v30  ;;  %v548_v20 = vadd.f32 %v546_v21, %v542_v31 }
 0x397   :  { %550 = vst.msk [vmem:[%s960_s7 + $0x8] sm:$0xff] %vm490_vm9, %v548_v20 }

</bundles_post_ra>
